<compile_context>
chip_gen: v6e
topology: v6e:2x2x1
jax: 0.10.0
libtpu: 0.0.40
codegen_flags: <defaults>
</compile_context>

<pallas_src>
import jax
import jax.numpy as jnp
from jax.experimental import pallas as pl
from jax.experimental.pallas import tpu as pltpu

HIDDEN = 128                 # fixed by the module definition
DEFAULT_MAX_TILE = 2048      # keeps the (128, tile) f32 intermediate <= 1 MiB
TARGET_X_BLOCK_BYTES = 2 * 1024 * 1024   # ~2 MiB bf16 x per grid step


def _round_up(x, m):
    return ((x + m - 1) // m) * m


def _pick_tile(batch, in_features, max_tile):
    """Batch tile (lane dim): multiple of 128, ~2 MiB of bf16 x per block."""
    lane = 128
    t = TARGET_X_BLOCK_BYTES // (2 * in_features)
    t = max(lane, min(max_tile, t))
    t = (t // lane) * lane
    # Never larger than the lane-padded batch itself.
    t = min(t, _round_up(batch, lane))
    return max(t, lane)


def _disc_kernel(xt_ref, w1t_ref, b1_ref, w2_ref, b2_ref, o_ref):
    # First linear: (128, F) bf16 @ (F, tile) bf16 -> (128, tile) f32 on MXU.
    h = jnp.dot(w1t_ref[...], xt_ref[...], preferred_element_type=jnp.float32)
    h = h + b1_ref[...]                       # (128, 1) f32 bias, lane-broadcast
    # LeakyReLU(0.01): mul + max (cheaper than cmp + mul + select).
    h = jnp.maximum(h, 0.01 * h)
    # Second linear: (1, 128) @ (128, tile) -> (1, tile) lane-dense logits.
    logit = jnp.dot(w2_ref[...], h, preferred_element_type=jnp.float32)
    logit = logit + b2_ref[0, 0]              # scalar bias from SMEM
    # Numerically safe sigmoid: clamp so exp never overflows, then EUP exp +
    # EUP approx reciprocal (keeps the epilogue off the VALU critical path).
    logit = jnp.clip(logit, -30.0, 30.0)
    o_ref[...] = pl.reciprocal(1.0 + jnp.exp(-logit), approx=True).astype(o_ref.dtype)


def discriminator_forward(x, w1, b1, w2, b2, *, max_tile=DEFAULT_MAX_TILE):
    """x: (B, F) f32; w1: (F, 128); b1: 128 elems; w2: (128, 1); b2: scalar-ish.

    Returns sigmoid(LeakyReLU(x @ w1 + b1) @ w2 + b2) with shape (B, 1).
    """
    batch, in_features = x.shape

    tile = _pick_tile(batch, in_features, max_tile)
    padded = _round_up(batch, tile)
    grid = (padded // tile,)

    # Feature-major activations: batch axis on lanes.  The transpose fuses
    # with the bf16 cast in XLA, so this costs no extra HBM pass.
    xt = x.astype(jnp.bfloat16).T                       # (F, B) bf16
    if padded != batch:
        xt = jnp.pad(xt, ((0, 0), (0, padded - batch)))

    w1t = jnp.asarray(w1, jnp.float32).reshape(in_features, HIDDEN).T
    w1t = w1t.astype(jnp.bfloat16)                      # (128, F) bf16
    b1_col = jnp.asarray(b1, jnp.float32).reshape(HIDDEN, 1)
    w2_row = jnp.asarray(w2, jnp.float32).reshape(1, HIDDEN)
    b2_sc = jnp.asarray(b2, jnp.float32).reshape(1, 1)

    cost = pl.CostEstimate(
        flops=2 * padded * in_features * HIDDEN + 2 * padded * HIDDEN,
        transcendentals=2 * padded,                     # exp + reciprocal
        bytes_accessed=(padded * in_features * 2 + in_features * HIDDEN * 2
                        + HIDDEN * 8 + padded * 4),
    )

    out = pl.pallas_call(
        _disc_kernel,
        out_shape=jax.ShapeDtypeStruct((1, padded), jnp.float32),
        grid=grid,
        in_specs=[
            # x^T tile marches along the batch (lane) axis; auto double-buffered.
            pl.BlockSpec((in_features, tile), lambda i: (0, i)),
            # Weights / biases: constant index_map -> VMEM-resident.
            pl.BlockSpec((HIDDEN, in_features), lambda i: (0, 0)),
            pl.BlockSpec((HIDDEN, 1), lambda i: (0, 0)),
            pl.BlockSpec((1, HIDDEN), lambda i: (0, 0)),
            # b2 scalar lives in SMEM.
            pl.BlockSpec(memory_space=pltpu.MemorySpace.SMEM),
        ],
        out_specs=pl.BlockSpec((1, tile), lambda i: (0, i)),
        compiler_params=pltpu.CompilerParams(
            dimension_semantics=("parallel",),          # megacore sharding on v7x
            vmem_limit_bytes=32 * 1024 * 1024,          # safe on v5e/v6e/v7x
        ),
        cost_estimate=cost,
    )(xt, w1t, b1_col, w2_row, b2_sc)

    # (1, padded) lane-dense slab -> (B, 1), dropping padded rows.
    return out[0, :batch].reshape(batch, 1)


def init_params(key, in_features):
    """Deterministic PyTorch-style init: U(-1/sqrt(fan_in), 1/sqrt(fan_in))."""
    k1, k2, k3, k4 = jax.random.split(key, 4)
    bound1 = 1.0 / jnp.sqrt(in_features)
    bound2 = 1.0 / jnp.sqrt(HIDDEN)
    w1 = jax.random.uniform(k1, (in_features, HIDDEN), jnp.float32, -bound1, bound1)
    b1 = jax.random.uniform(k2, (1, HIDDEN), jnp.float32, -bound1, bound1)
    w2 = jax.random.uniform(k3, (HIDDEN, 1), jnp.float32, -bound2, bound2)
    b2 = jax.random.uniform(k4, (1, 1), jnp.float32, -bound2, bound2)
    return w1, b1, w2, b2


def reference_forward(x, w1, b1, w2, b2):
    """Pure-JAX f32 reference matching the PyTorch module."""
    h = x @ w1 + b1.reshape(1, HIDDEN)
    h = jnp.where(h > 0, h, 0.01 * h)
    logit = h @ w2.reshape(HIDDEN, 1) + b2.reshape(1, 1)
    return jax.nn.sigmoid(logit)


if __name__ == "__main__":
    key = jax.random.PRNGKey(0)
    k_x, k_p, k_x2 = jax.random.split(key, 3)

    batch, in_features = 8, 32
    x = jax.random.normal(k_x, (batch, in_features), jnp.float32)
    w1, b1, w2, b2 = init_params(k_p, in_features)

    out = jax.block_until_ready(discriminator_forward(x, w1, b1, w2, b2))
    ref = reference_forward(x, w1, b1, w2, b2)
    assert out.shape == (batch, 1)
    # bf16 first matmul + approx reciprocal -> loosened tolerance vs f32 ref.
    assert jnp.allclose(out, ref, atol=2e-2, rtol=2e-2), "mismatch vs JAX reference"

    # Exercise a multi-step grid with batch padding (300 rows, tile 128 -> grid 3).
    batch2 = 300
    x2 = jax.random.normal(k_x2, (batch2, in_features), jnp.float32)
    out2 = jax.block_until_ready(
        discriminator_forward(x2, w1, b1, w2, b2, max_tile=128))
    ref2 = reference_forward(x2, w1, b1, w2, b2)
    assert out2.shape == (batch2, 1)
    assert jnp.allclose(out2, ref2, atol=2e-2, rtol=2e-2), "mismatch (gridded)"

    print("KERNEL_OK")
</pallas_src>

<mosaic_0001>
module attributes {stable_mosaic.version = 11 : i64} {
  func.func @_disc_kernel(%arg0: i32, %arg1: memref<32x128xbf16, #tpu.memory_space<vmem>>, %arg2: memref<128x32xbf16, #tpu.memory_space<vmem>>, %arg3: memref<128x1xf32, #tpu.memory_space<vmem>>, %arg4: memref<1x128xf32, #tpu.memory_space<vmem>>, %arg5: memref<1x1xf32, #tpu.memory_space<smem>>, %arg6: memref<1x128xf32, #tpu.memory_space<vmem>>) attributes {dimension_semantics = [#tpu.dimension_semantics<parallel>], iteration_bounds = array<i64: 1>, scalar_prefetch = 0 : i64, scratch_operands = 0 : i64, tpu.core_type = #tpu.core_type<tc>, window_params = [{transform_indices = @transform_0, window_bounds = array<i64: 32, 128>}, {pipeline_mode = #tpu.pipeline_mode<synchronous>, transform_indices = @transform_1, window_bounds = array<i64: 128, 32>}, {pipeline_mode = #tpu.pipeline_mode<synchronous>, transform_indices = @transform_2, window_bounds = array<i64: 128, 1>}, {pipeline_mode = #tpu.pipeline_mode<synchronous>, transform_indices = @transform_3, window_bounds = array<i64: 1, 128>}, {transform_indices = @transform_4, window_bounds = array<i64: 1, 1>}, {transform_indices = @transform_5, window_bounds = array<i64: 1, 128>}]} {
    %c0 = arith.constant 0 : index
    %c0_0 = arith.constant 0 : index
    %0 = vector.load %arg2[%c0, %c0_0] : memref<128x32xbf16, #tpu.memory_space<vmem>>, vector<128x32xbf16>
    %c0_1 = arith.constant 0 : index
    %c0_2 = arith.constant 0 : index
    %1 = vector.load %arg1[%c0_1, %c0_2] : memref<32x128xbf16, #tpu.memory_space<vmem>>, vector<32x128xbf16>
    %cst = arith.constant dense<0.000000e+00> : vector<128x128xf32>
    %2 = tpu.matmul %0, %1, %cst {dimension_numbers = #tpu.dot_dimension_numbers<[1], [0], [0], [1], [0, 0, 1, 1], [], []>} : vector<128x32xbf16>, vector<32x128xbf16>, vector<128x128xf32> -> vector<128x128xf32>
    %c0_3 = arith.constant 0 : index
    %c0_4 = arith.constant 0 : index
    %3 = vector.load %arg3[%c0_3, %c0_4] : memref<128x1xf32, #tpu.memory_space<vmem>>, vector<128x1xf32>
    %4 = vector.broadcast %3 : vector<128x1xf32> to vector<128x128xf32>
    %5 = arith.addf %2, %4 : vector<128x128xf32>
    %cst_5 = arith.constant 0.00999999977 : f32
    %6 = vector.broadcast %cst_5 : f32 to vector<128x128xf32>
    %7 = arith.mulf %6, %5 : vector<128x128xf32>
    %8 = arith.maximumf %5, %7 : vector<128x128xf32>
    %c0_6 = arith.constant 0 : index
    %c0_7 = arith.constant 0 : index
    %9 = vector.load %arg4[%c0_6, %c0_7] : memref<1x128xf32, #tpu.memory_space<vmem>>, vector<1x128xf32>
    %cst_8 = arith.constant dense<0.000000e+00> : vector<1x128xf32>
    %10 = tpu.matmul %9, %8, %cst_8 {dimension_numbers = #tpu.dot_dimension_numbers<[1], [0], [0], [1], [0, 0, 1, 1], [], []>} : vector<1x128xf32>, vector<128x128xf32>, vector<1x128xf32> -> vector<1x128xf32>
    %c0_9 = arith.constant 0 : index
    %c0_10 = arith.constant 0 : index
    %11 = memref.load %arg5[%c0_9, %c0_10] : memref<1x1xf32, #tpu.memory_space<smem>>
    %12 = vector.broadcast %11 : f32 to vector<1x128xf32>
    %13 = arith.addf %10, %12 : vector<1x128xf32>
    %cst_11 = arith.constant -3.000000e+01 : f32
    %cst_12 = arith.constant 3.000000e+01 : f32
    %14 = vector.broadcast %cst_11 : f32 to vector<1x128xf32>
    %15 = arith.maximumf %14, %13 : vector<1x128xf32>
    %16 = vector.broadcast %cst_12 : f32 to vector<1x128xf32>
    %17 = arith.minimumf %16, %15 : vector<1x128xf32>
    %cst_13 = arith.constant 0.000000e+00 : f32
    %18 = vector.broadcast %cst_13 : f32 to vector<1x128xf32>
    %19 = arith.subf %18, %17 : vector<1x128xf32>
    %20 = math.exp %19 : vector<1x128xf32>
    %cst_14 = arith.constant 1.000000e+00 : f32
    %21 = vector.broadcast %cst_14 : f32 to vector<1x128xf32>
    %22 = arith.addf %21, %20 : vector<1x128xf32>
    %23 = tpu.reciprocal %22 {approx = true} : vector<1x128xf32> -> vector<1x128xf32>
    %c0_15 = arith.constant 0 : index
    %c0_16 = arith.constant 0 : index
    %24 = vector.load %arg6[%c0_15, %c0_16] : memref<1x128xf32, #tpu.memory_space<vmem>>, vector<1x128xf32>
    tpu.vector_store %arg6[%c0_15, %c0_16], %23 {strides = array<i32>} : memref<1x128xf32, #tpu.memory_space<vmem>>, vector<1x128xf32>,
    return
  }
  func.func @transform_0(%arg0: i32) -> (i32, i32) {
    %c0_i32 = arith.constant 0 : i32
    %c0_i32_0 = arith.constant 0 : i32
    return %c0_i32, %arg0 : i32, i32
  }
  func.func @transform_1(%arg0: i32) -> (i32, i32) {
    %c0_i32 = arith.constant 0 : i32
    %c0_i32_0 = arith.constant 0 : i32
    %c0_i32_1 = arith.constant 0 : i32
    return %c0_i32, %c0_i32_0 : i32, i32
  }
  func.func @transform_2(%arg0: i32) -> (i32, i32) {
    %c0_i32 = arith.constant 0 : i32
    %c0_i32_0 = arith.constant 0 : i32
    %c0_i32_1 = arith.constant 0 : i32
    return %c0_i32, %c0_i32_0 : i32, i32
  }
  func.func @transform_3(%arg0: i32) -> (i32, i32) {
    %c0_i32 = arith.constant 0 : i32
    %c0_i32_0 = arith.constant 0 : i32
    %c0_i32_1 = arith.constant 0 : i32
    return %c0_i32, %c0_i32_0 : i32, i32
  }
  func.func @transform_4(%arg0: i32) -> (i32, i32) {
    %c0_i32 = arith.constant 0 : i32
    %c0_i32_0 = arith.constant 0 : i32
    %c0_i32_1 = arith.constant 0 : i32
    return %c0_i32, %c0_i32_0 : i32, i32
  }
  func.func @transform_5(%arg0: i32) -> (i32, i32) {
    %c0_i32 = arith.constant 0 : i32
    %c0_i32_0 = arith.constant 0 : i32
    return %c0_i32, %arg0 : i32, i32
  }
}

</mosaic_0001>

<bundles_post_ra>
// kernel: tpu_custom_call.1
= control target key start
LH: loop header
LB: loop body
LE: loop exit
PB: predicated region body
PF: predicated region fallthrough
CT: control target
= control target key end

     0   :  { %vm191_vm0 = vcmask 261120   ;;  %v583_v3 = vmov 0   ;;  %s744_s0 = inlined_call_operand.vmem [shape: bf16[32,128], index: 0, kind: input, shape index: {}]   ;;  %s745_s1 = inlined_call_operand.vmem [shape: bf16[128,32], index: 1, kind: input, shape index: {}]   ;;  %s746_s2 = inlined_call_operand.vmem [shape: f32[128,1], index: 2, kind: input, shape index: {}]   ;;  %s747_s3 = inlined_call_operand.vmem [shape: f32[1,128], index: 3, kind: input, shape index: {}]   ;;  %s748_s4 = inlined_call_operand.<no memory space> [shape: f32[1,1], index: 4, kind: input, shape index: {}]   ;;  %s749_s5 = inlined_call_operand.hbm [shape: f32[1,128], index: 5, kind: output, shape index: {}]  }
   0x1   :  { %v547_v0 = vld [vmem:[%s744_s0 + $0x8] sm:$0xff]   ;;  %v548_v1 = vld [vmem:[%s744_s0] sm:$0xff]   ;;  %546 = vset.pattern.permute.xlu1 %v583_v3  ;;  %545 = vset.pattern.permute.xlu0 %v583_v3  ;;  %v551_v5 = vld [vmem:[%s745_s1 + $0x10] sm:$0xff]  }
   0x2   :  { %486 = vmatprep.subr.bf16.mxu0 %v547_v0  ;;  %v549_v2 = vld [vmem:[%s745_s1] sm:$0xff]   ;;  %v550_v4 = vld [vmem:[%s745_s1 + $0x8] sm:$0xff]   ;;  %v58_v7 = vld [vmem:[%s746_s2 + $0x78] sm:$0xff] }
   0x3   :  { %487 = vmatpush3.bf16.msra.mxu0 %v547_v0  ;;  %490 = vmatprep.mubr.msk.bf16.mxu0 %vm191_vm0, %v549_v2  ;;  %v56_v6 = vld [vmem:[%s746_s2 + $0x68] sm:$0xff]  ;;  %v55_v8 = vld [vmem:[%s746_s2 + $0x60] sm:$0xff]  ;;  %v57_v9 = vld [vmem:[%s746_s2 + $0x70] sm:$0xff] }
   0x4   :  { %488 = vmatprep.subr.bf16.mxu0 %v548_v1  ;;  %126 = vperm.xlu1 %546, %v56_v6   ;;  %v552_v10 = vld [vmem:[%s745_s1 + $0x18] sm:$0xff]   ;;  %v553_v11 = vld [vmem:[%s745_s1 + $0x20] sm:$0xff]  }
   0x5   :  { %136 = vperm.xlu0 %545, %v58_v7  }
   0x7   :  { %489 = vmatpush3.bf16.msra.mxu0 %v548_v1 }
   0x8   :  { %121 = vperm.xlu1 %546, %v55_v8  }
   0xa   :  { %491 = vmatmul.mubr.msk.bf16.vlgmr.msra.gmra.mxu0 %vm191_vm0, %v550_v4 }
   0xb   :  { %494 = vmatprep.mubr.msk.bf16.mxu0 %vm191_vm0, %v551_v5 }
   0xc   :  { %11 = vsyncpa [#allocation4], 0  ;;  %131 = vperm.xlu0 %545, %v57_v9   ;;  %v53_v12 = vld [vmem:[%s746_s2 + $0x50] sm:$0xff]  ;;  %v54_v13 = vld [vmem:[%s746_s2 + $0x58] sm:$0xff]  ;;  %v584_v27 = vmov 0.0   ;;  %vm585_vm1 = vmmov 0  }
   0xd   :  { %111 = vperm.xlu1 %546, %v53_v12   ;;  %v51_v14 = vld [vmem:[%s746_s2 + $0x40] sm:$0xff]  ;;  %v52_v15 = vld [vmem:[%s746_s2 + $0x48] sm:$0xff]  ;;  %v555_v17 = vld [vmem:[%s745_s1 + $0x30] sm:$0xff]   ;;  %506 = vmatprep.subr.mxu1 %v584_v27  ;;  %s586_s20 = smov [#allocation3]  }
   0xe   :  { %v554_v16 = vld [vmem:[%s745_s1 + $0x28] sm:$0xff]   ;;  %v49_v18 = vld [vmem:[%s746_s2 + $0x30] sm:$0xff]  ;;  %v50_v19 = vld [vmem:[%s746_s2 + $0x38] sm:$0xff]  ;;  %538 = vmatprep.mubr.msk.f32.mxu1 %vm585_vm1, %v584_v27 }
   0xf   :  { %v47_v20 = vld [vmem:[%s746_s2 + $0x20] sm:$0xff]  ;;  %v48_v21 = vld [vmem:[%s746_s2 + $0x28] sm:$0xff]  ;;  %v556_v22 = vld [vmem:[%s745_s1 + $0x38] sm:$0xff]  }
  0x10   :  { %116 = vperm.xlu0 %545, %v54_v13   ;;  %v45_v23 = vld [vmem:[%s746_s2 + $0x10] sm:$0xff]  ;;  %v46_v24 = vld [vmem:[%s746_s2 + $0x18] sm:$0xff]  ;;  %v43_v25 = vld [vmem:[%s746_s2] sm:$0xff] }
  0x11   :  { %101 = vperm.xlu1 %546, %v51_v14   ;;  %v44_v26 = vld [vmem:[%s746_s2 + $0x8] sm:$0xff] }
  0x12   :  { %495 = vmatmul.mubr.msk.bf16.gmra.mxu0 %vm191_vm0, %v552_v10 }
  0x13   :  { %498 = vmatprep.mubr.msk.bf16.mxu0 %vm191_vm0, %v553_v11 }
  0x14   :  { %106 = vperm.xlu0 %545, %v52_v15  }
  0x15   :  { %91 = vperm.xlu1 %546, %v49_v18  }
  0x18   :  { %96 = vperm.xlu0 %545, %v50_v19  }
  0x19   :  { %81 = vperm.xlu1 %546, %v47_v20  }
  0x1a   :  { %499 = vmatmul.mubr.msk.bf16.gmra.mxu0 %vm191_vm0, %v554_v16 }
  0x1b   :  { %502 = vmatprep.mubr.msk.bf16.mxu0 %vm191_vm0, %v555_v17 }
  0x1c   :  { %86 = vperm.xlu0 %545, %v48_v21  }
  0x1d   :  { %71 = vperm.xlu1 %546, %v45_v23  }
  0x20   :  { %76 = vperm.xlu0 %545, %v46_v24  }
  0x21   :  { %61 = vperm.xlu1 %546, %v43_v25  }
  0x22   :  { %503 = vmatmul.mubr.msk.bf16.gmra.mxu0 %vm191_vm0, %v556_v22 }
  0x24   :  { %66 = vperm.xlu0 %545, %v44_v26  }
  0x7f   :  { %v127_v34 = vpop.permute.xlu1 %126 }
  0x80   :  { %v137_v32 = vpop.permute.xlu0 %136 }
  0x83   :  { %v122_v39 = vpop.permute.xlu1 %121 }
  0x87   :  { %v132_v37 = vpop.permute.xlu0 %131 }
  0x88   :  { %v112_v44 = vpop.permute.xlu1 %111 }
  0x8b   :  { %v117_v42 = vpop.permute.xlu0 %116 }
  0x8c   :  { %v102_v50 = vpop.permute.xlu1 %101 }
  0x8f   :  { %v107_v47 = vpop.permute.xlu0 %106 }
  0x90   :  { %v92_v62 = vpop.permute.xlu1 %91 }
  0x93   :  { %v97_v58 = vpop.permute.xlu0 %96 }
  0x94   :  { %v82_v9 = vpop.permute.xlu1 %81 }
  0x97   :  { %v87_v5 = vpop.permute.xlu0 %86 }
  0x98   :  { %v72_v20 = vpop.permute.xlu1 %71 }
  0x9b   :  { %v77_v16 = vpop.permute.xlu0 %76 }
  0xca   :  { %v705_v28 = vpop.f32.mrf.mxu0 }
  0xcc   :  { %v707_v29 = vpop.f32.mrf.mxu0 }
  0xce   :  { %v709_v30 = vpop.f32.mrf.mxu0 }
  0xcf   :  { %v262_v24 = vadd.f32 %v709_v30, %v77_v16 }
  0xd0   :  { %v711_v31 = vpop.f32.mrf.mxu0 }
  0xd2   :  { %v496_v33 = vpop.f32.mrf.mxu0 }
  0xd3   :  { %v275_v13 = vadd.f32 %v496_v33, %v92_v62  ;;  %v259_v33 = vadd.f32 %v705_v28, %v72_v20 }
  0xd4   :  { %v713_v35 = vpop.f32.mrf.mxu0 }
  0xd5   :  { %v319_v21 = vmul.f32 0.01, %v275_v13  ;;  %v267_v22 = vadd.f32 %v713_v35, %v82_v9  ;;  %v316_v35 = vmul.f32 0.01, %v262_v24  ;;  %v315_v30 = vmul.f32 0.01, %v259_v33 }
  0xd6   :  { %v497_v36 = vpop.f32.mrf.mxu0 }
  0xd7   :  { %v278_v10 = vadd.f32 %v497_v36, %v97_v58  ;;  %v317_v36 = vmul.f32 0.01, %v267_v22  ;;  %v332_v28 = vmax.f32 %v262_v24, %v316_v35 }
  0xd8   :  { %v269_v38 = vpop.f32.mrf.mxu0 }
  0xd9   :  { %v320_v17 = vmul.f32 0.01, %v278_v10  ;;  %v270_v18 = vadd.f32 %v269_v38, %v87_v5 }
  0xda   :  { %v500_v40 = vpop.f32.mrf.mxu0 }
  0xdb   :  { %v291_v63 = vadd.f32 %v500_v40, %v112_v44  ;;  %v336_v25 = vmax.f32 %v278_v10, %v320_v17  ;;  %v318_v26 = vmul.f32 0.01, %v270_v18 }
  0xdc   :  { %v282_v41 = vpop.f32.mrf.mxu0 }
  0xdd   :  { %v323_v6 = vmul.f32 0.01, %v291_v63  ;;  %v283_v7 = vadd.f32 %v282_v41, %v102_v50  ;;  %v333_v41 = vmax.f32 %v267_v22, %v317_v36 }
  0xde   :  { %v501_v43 = vpop.f32.mrf.mxu0 }
  0xdf   :  { %v294_v59 = vadd.f32 %v501_v43, %v117_v42  ;;  %v339_v14 = vmax.f32 %v291_v63, %v323_v6  ;;  %v321_v15 = vmul.f32 0.01, %v283_v7  ;;  %v331_v43 = vmax.f32 %v259_v33, %v315_v30 }
  0xe0   :  { %v285_v45 = vpop.f32.mrf.mxu0 }
  0xe1   :  { %v324_v2 = vmul.f32 0.01, %v294_v59  ;;  %v286_v3 = vadd.f32 %v285_v45, %v107_v47  ;;  %v337_v23 = vmax.f32 %v283_v7, %v321_v15 }
  0xe2   :  { %v504_v46 = vpop.f32.mrf.mxu0 }
  0xe3   :  { %v307_v49 = vadd.f32 %v504_v46, %v132_v37  ;;  %v340_v11 = vmax.f32 %v294_v59, %v324_v2  ;;  %v322_v12 = vmul.f32 0.01, %v286_v3  ;;  %v62_v37 = vpop.permute.xlu1 %61  ;;  %v347_v46 = vstv %s748_s4 }
  0xe4   :  { %v298_v48 = vpop.f32.mrf.mxu0  ;;  %v251_v40 = vadd.f32 %v707_v29, %v62_v37  ;;  %v345_v29 = vld [vmem:[%s747_s3] sm:$0x1]  ;;  %s432_s3 = sshll.u32 %s586_s20, 4  ;;  %s433_s3 = int_to_ptr.vmem [resolvable:$true] %s432_s3 }
  0xe5   :  { %v327_v54 = vmul.f32 0.01, %v307_v49  ;;  %v299_v55 = vadd.f32 %v298_v48, %v122_v39  ;;  %v338_v19 = vmax.f32 %v286_v3, %v322_v12  ;;  %v334_v39 = vmax.f32 %v270_v18, %v318_v26  ;;  %s561_s21 = scalar_lea.vmem %s433_s3, 16  ;;  %s565_s22 = scalar_lea.vmem %s433_s3, 32 }
  0xe6   :  { %v505_v51 = vpop.f32.mrf.mxu0  ;;  %v313_v44 = vmul.f32 0.01, %v251_v40  ;;  %p562_p0 = scmp.ne.s32.totalorder %s433_s3, %s561_s21  ;;  %p566_p1 = scmp.lt.s32.totalorder %s433_s3, %s433_s3 }
  0xe7   :  { %v310_v52 = vadd.f32 %v505_v51, %v137_v32  ;;  %v343_v0 = vmax.f32 %v307_v49, %v327_v54  ;;  %v325_v1 = vmul.f32 0.01, %v299_v55  ;;  %v67_v32 = vpop.permute.xlu0 %66  ;;  %p567_p2 = scmp.lt.s32.totalorder %s565_s22, %s561_s21 }
  0xe8   :  { %v301_v53 = vpop.f32.mrf.mxu0  ;;  %v254_v38 = vadd.f32 %v711_v31, %v67_v32  ;;  %v329_v45 = vmax.f32 %v251_v40, %v313_v44 }
  0xe9   :  { %v328_v56 = vmul.f32 0.01, %v310_v52  ;;  %v302_v57 = vadd.f32 %v301_v53, %v127_v34  ;;  %v341_v8 = vmax.f32 %v299_v55, %v325_v1  ;;  %v335_v34 = vmax.f32 %v275_v13, %v319_v21  ;;  %p568_p3 = por %p567_p2, %p566_p1 }
  0xea   :  { %v314_v42 = vmul.f32 0.01, %v254_v38 }
  0xeb   :  { %v326_v60 = vmul.f32 0.01, %v302_v57  ;;  %v344_v61 = vmax.f32 %v310_v52, %v328_v56  ;;  %p569_p4 = pnand %p568_p3, %p562_p0 }
  0xec   :  { %v330_v31 = vmax.f32 %v254_v38, %v314_v42 }
  0xed   :  { %507 = vmatpush3.msra.mxu1 %v344_v61  ;;  %v342_v4 = vmax.f32 %v302_v57, %v326_v60 }
  0xee   :  { %508 = vmatprep.subr.mxu1 %v584_v27 }
  0xef   :  { %509 = vmatpush3.msra.mxu1 %v343_v0 }
  0xf0   :  { %510 = vmatprep.subr.mxu1 %v584_v27 }
  0xf1   :  { %511 = vmatpush3.msra.mxu1 %v342_v4 }
  0xf2   :  { %512 = vmatprep.subr.mxu1 %v584_v27 }
  0xf3   :  { %513 = vmatpush3.msra.mxu1 %v341_v8 }
  0xf4   :  { %514 = vmatprep.subr.mxu1 %v584_v27 }
  0xf5   :  { %515 = vmatpush3.msra.mxu1 %v340_v11 }
  0xf6   :  { %516 = vmatprep.subr.mxu1 %v584_v27 }
  0xf7   :  { %517 = vmatpush3.msra.mxu1 %v339_v14 }
  0xf8   :  { %518 = vmatprep.subr.mxu1 %v584_v27 }
  0xf9   :  { %519 = vmatpush3.msra.mxu1 %v338_v19 }
  0xfa   :  { %520 = vmatprep.subr.mxu1 %v584_v27 }
  0xfb   :  { %521 = vmatpush3.msra.mxu1 %v337_v23 }
  0xfc   :  { %522 = vmatprep.subr.mxu1 %v584_v27 }
  0xfd   :  { %523 = vmatpush3.msra.mxu1 %v336_v25 }
  0xfe   :  { %524 = vmatprep.subr.mxu1 %v584_v27 }
  0xff   :  { %525 = vmatpush3.msra.mxu1 %v335_v34 }
 0x100   :  { %526 = vmatprep.subr.mxu1 %v584_v27 }
 0x101   :  { %527 = vmatpush3.msra.mxu1 %v334_v39 }
 0x102   :  { %528 = vmatprep.subr.mxu1 %v584_v27 }
 0x103   :  { %529 = vmatpush3.msra.mxu1 %v333_v41 }
 0x104   :  { %530 = vmatprep.subr.mxu1 %v584_v27 }
 0x105   :  { %531 = vmatpush3.msra.mxu1 %v332_v28 }
 0x106   :  { %532 = vmatprep.subr.mxu1 %v584_v27 }
 0x107   :  { %533 = vmatpush3.msra.mxu1 %v331_v43 }
 0x108   :  { %534 = vmatprep.subr.mxu1 %v584_v27 }
 0x109   :  { %535 = vmatpush3.msra.mxu1 %v330_v31 }
 0x10a   :  { %536 = vmatprep.subr.mxu1 %v584_v27 }
 0x10b   :  { %537 = vmatpush3.msra.mxu1 %v329_v45 }
 0x10c   :  { %539 = vmatmul.mubr.f32.vlgmr.msra.gmra.mxu1 %v345_v29 }
 0x1cc   :  { %v414_v47 = vpop.f32.mrf.mxu1 }
 0x1cd   :  { %v415_v48 = vadd.f32 %v414_v47, %v347_v46 }
 0x1ce   :  { %v540_v49 = vpop.f32.mrf.mxu1 }
 0x1cf   :  { %v458_v50 = vclamps-f32 %v415_v48, 30.0 }
 0x1d1   :  { %v420_v51 = vsub.f32 0.0, %v458_v50 }
 0x1d3   :  { %v421_v52 = vmul.f32 1.442695, %v420_v51 }
 0x1d5   :  { %557 = vpow2.f32 %v421_v52 }
 0x1e2   :  { %v558_v53 = vpop.eup %557 }
 0x1e3   :  { %v423_v54 = vadd.f32 1.0, %v558_v53 }
 0x1e5   :  { %559 = vrcp.f32 %v423_v54 }
 0x1f2   :  { %v560_v27 = vpop.eup %559 }
 0x1f3   :  { %425 = vst [vmem:[#allocation3] sm:$0x1] %v560_v27 }
 0x1f4   :  { %572 = shalt.err (!%p569_p4)
}
 0x1f5   :  { %435 = dma.vmem_to_hbm [thread:$0]  %s433_s3, 16, %s749_s5, [#allocation4]  }
 0x1f6   :  { %581 = dma.done.wait [#allocation4], 16  }
 0x1f7   :  { %582 = vsyncadd [#allocation4], 4294967280 }
 0x1f8   :  { %439 = vsyncpa [#allocation4], 1 }

</bundles_post_ra>
